<compile_context>
chip_gen: v6e
topology: v6e:2x2x1
jax: 0.10.0
libtpu: 0.0.40
codegen_flags: <defaults>
</compile_context>

<pallas_src>
import functools

import numpy as np
import jax
import jax.numpy as jnp
from jax.experimental import pallas as pl
from jax.experimental.pallas import tpu as pltpu


# ----------------------------------------------------------------------------
# Fused Pallas kernel: conv_t1 -> LeakyReLU -> (packed) conv_t2, all in VMEM
# ----------------------------------------------------------------------------
def _fused_upsample_kernel(x_ref, w1_ref, b1_ref, w2_ref, b2_ref, o_ref, *,
                           t_tile, total_q, halo_lo, kdq, negslope):
    # x_ref : (1, 1, t_tile + kdq - 1, Kw1*C_in)  halo'd im2col input window (bf16)
    # w1_ref: (Kw1*C_in, s0*C_hid)                layer-1 sub-pixel weights (bf16)
    # b1_ref: (1, s0*C_hid)                       layer-1 bias, phase-major (f32)
    # w2_ref: (kdq, s0*C_hid, s0*s1*C_out)        fused layer-2 weights (bf16)
    # b2_ref: (1, s0*s1*C_out)                    layer-2 bias, phase-major (f32)
    # o_ref : (1, t_tile, s0*s1*C_out)            packed output (bf16)
    i = pl.program_id(1)

    # ---- layer 1: single matmul, taps folded into the contraction dim ------
    xw = x_ref[0, 0]                                          # (win, Kw1*C_in)
    h = jnp.dot(xw, w1_ref[...], preferred_element_type=jnp.float32)
    h = h + b1_ref[...]
    h = jnp.where(h >= 0, h, negslope * h)                    # LeakyReLU(0.4)

    # Halo rows that fall outside the real sequence are layer-2 zero padding.
    q = jax.lax.broadcasted_iota(jnp.int32, h.shape, 0) + (i * t_tile - halo_lo)
    h = jnp.where((q >= 0) & (q < total_q), h, 0.0)
    hb = h.astype(w2_ref.dtype)                               # bf16 for the MXU

    # ---- layer 2 on the phase-packed intermediate (never leaves VMEM) ------
    acc = jnp.dot(hb[0:t_tile, :], w2_ref[0], preferred_element_type=jnp.float32)
    for j in range(1, kdq):                                   # static, kdq == 3
        acc += jnp.dot(hb[j:j + t_tile, :], w2_ref[j],
                       preferred_element_type=jnp.float32)
    acc = acc + b2_ref[...]
    o_ref[0] = acc.astype(o_ref.dtype)


# ----------------------------------------------------------------------------
# Host-side weight preprocessing (all tiny, done in numpy once)
# ----------------------------------------------------------------------------
def _subpixel_weights(W, K, s, p):
    """Stride-1 equivalent of ConvTranspose1d(W, stride=s, padding=p).

    W: (C_in, C_out, K) -> W_eq: (Kw, C_in, s*C_out), PHASE-MAJOR output
    channels (index = r*C_out + o), such that
        h[s*q + r, :] = sum_j x_zp[q + j + m_min, :] @ W_eq[j]
    with x zero-padded by (-m_min, m_max) in time.
    """
    W = np.asarray(W, np.float32)
    C_in, C_out, _ = W.shape
    m_min = -((K - 1 - p) // s)
    m_max = (s - 1 + p) // s
    Kw = m_max - m_min + 1
    W_eq = np.zeros((Kw, C_in, s * C_out), np.float32)
    for j in range(Kw):
        m = j + m_min
        for r in range(s):
            k = r + p - m * s
            if 0 <= k < K:
                W_eq[j, :, r * C_out:(r + 1) * C_out] = W[:, :, k]
    return W_eq, m_min, m_max, Kw


def _fuse_second_layer(W2_eq, m_min2, Kw2, s1, C_hid, C_out, s2):
    """Rewrite layer 2's stride-1 conv so it acts on layer 1's phase-packed rows
    h_packed[q, r*C_hid + c] = h_fine[s1*q + r, c].  Returns W2_f of shape
    (Kdq, s1*C_hid, s1*s2*C_out) with
        z_packed[q, (s2*r + r2)*C_out + o] = sum_dq h_packed[q+dq] @ W2_f[dq-dq_lo]
    """
    m_max2 = m_min2 + Kw2 - 1
    dq_lo = m_min2 // s1
    dq_hi = (s1 - 1 + m_max2) // s1
    Kdq = dq_hi - dq_lo + 1
    W2_f = np.zeros((Kdq, s1 * C_hid, s1 * s2 * C_out), np.float32)
    for dqi in range(Kdq):
        dq = dqi + dq_lo
        for dr in range(s1):
            for r in range(s1):
                j2 = s1 * dq + dr - r - m_min2
                if 0 <= j2 < Kw2:
                    W2_f[dqi,
                         dr * C_hid:(dr + 1) * C_hid,
                         r * s2 * C_out:(r + 1) * s2 * C_out] = W2_eq[j2]
    return W2_f, dq_lo, dq_hi, Kdq


# ----------------------------------------------------------------------------
# Wrapper
# ----------------------------------------------------------------------------
def transposed_upsample_net_forward(x_nct, params, *, t_tile=64,
                                    compute_dtype=jnp.bfloat16):
    """x_nct: [B, C_in, T] (PyTorch NCT). Returns [B, C_out, s0*s1*T].

    params = [(W, b, K, s, p)] * 2 with PyTorch ConvTranspose1d weight layout
    (C_in, C_out, K).  For real TTS-length sequences pick t_tile ~ 512-2048
    (multiple of 8); per-step double-buffered working set stays well under the
    32 MiB scoped VMEM limit (safe on v7x's 64 MiB physical VMEM).
    """
    assert len(params) == 2, "fused kernel implements the 2-layer default net"
    (W1, b1, K1, s1, p1), (W2, b2, K2, s2, p2) = params
    B, C_in, T = x_nct.shape
    C_hid = np.asarray(W1).shape[1]
    C_out = np.asarray(W2).shape[1]

    # -- equivalent sub-pixel / fused weights (host, tiny) --------------------
    W1_eq, m_min1, m_max1, Kw1 = _subpixel_weights(W1, K1, s1, p1)
    W1_packed = W1_eq.reshape(Kw1 * C_in, s1 * C_hid)          # taps -> contraction
    b1_eq = np.tile(np.asarray(b1, np.float32), s1)[None, :]

    W2_eq, m_min2, _, Kw2 = _subpixel_weights(W2, K2, s2, p2)
    W2_f, dq_lo, dq_hi, Kdq = _fuse_second_layer(W2_eq, m_min2, Kw2,
                                                 s1, C_hid, C_out, s2)
    b2_eq = np.tile(np.asarray(b2, np.float32), s1 * s2)[None, :]

    C_eff1 = s1 * C_hid
    C_eff2 = s1 * s2 * C_out
    halo_lo, halo_hi = -dq_lo, dq_hi

    # -- time tiling ----------------------------------------------------------
    t_tile = min(t_tile, T)
    assert T % t_tile == 0, "T must be divisible by t_tile"
    n_tiles = T // t_tile
    win = t_tile + halo_lo + halo_hi

    # -- halo'd, tap-folded (im2col) input windows; bf16 through HBM ----------
    x_btc = jnp.transpose(x_nct, (0, 2, 1)).astype(compute_dtype)   # [B, T, C_in]
    pad_l = halo_lo - m_min1
    pad_r = halo_hi + m_max1
    x_p = jnp.pad(x_btc, ((0, 0), (pad_l, pad_r), (0, 0)))
    T_ext = T + halo_lo + halo_hi
    x_im2col = jnp.concatenate([x_p[:, j:j + T_ext, :] for j in range(Kw1)],
                               axis=-1)                 # [B, T_ext, Kw1*C_in]
    widx = jnp.arange(n_tiles)[:, None] * t_tile + jnp.arange(win)[None, :]
    x_win = x_im2col[:, widx, :]                        # [B, n_tiles, win, Kw1*C_in]

    kernel = functools.partial(_fused_upsample_kernel, t_tile=t_tile,
                               total_q=T, halo_lo=halo_lo, kdq=Kdq,
                               negslope=0.4)

    z = pl.pallas_call(
        kernel,
        out_shape=jax.ShapeDtypeStruct((B, T, C_eff2), compute_dtype),
        grid=(B, n_tiles),
        in_specs=[
            pl.BlockSpec((1, 1, win, Kw1 * C_in), lambda b, i: (b, i, 0, 0)),
            # constant index_maps -> fetched once, stay VMEM-resident
            pl.BlockSpec((Kw1 * C_in, C_eff1), lambda b, i: (0, 0)),
            pl.BlockSpec((1, C_eff1), lambda b, i: (0, 0)),
            pl.BlockSpec((Kdq, C_eff1, C_eff2), lambda b, i: (0, 0, 0)),
            pl.BlockSpec((1, C_eff2), lambda b, i: (0, 0)),
        ],
        out_specs=pl.BlockSpec((1, t_tile, C_eff2), lambda b, i: (b, i, 0)),
        compiler_params=pltpu.CompilerParams(
            dimension_semantics=("parallel", "parallel"),
            vmem_limit_bytes=32 * 1024 * 1024),
    )(x_win,
      jnp.asarray(W1_packed).astype(compute_dtype),
      jnp.asarray(b1_eq),
      jnp.asarray(W2_f).astype(compute_dtype),
      jnp.asarray(b2_eq))

    # depth-to-space + NCT: z[b, q, p*C_out + o] -> out[b, o, (s1*s2)*q + p]
    # TODO(synk): emit this directly from the kernel in a lane-dense NCT layout
    # (needs an in-kernel phase/time interleave); kept in XLA for now.
    s_tot = s1 * s2
    out = z.reshape(B, T, s_tot, C_out).transpose(0, 3, 1, 2)
    return out.reshape(B, C_out, T * s_tot)


# ----------------------------------------------------------------------------
# Pure-numpy reference (direct scatter form of ConvTranspose1d)
# ----------------------------------------------------------------------------
def _conv_transpose1d_ref(x, W, b, stride, pad):
    B, C_in, T = x.shape
    _, C_out, K = W.shape
    L = (T - 1) * stride - 2 * pad + K
    out = np.zeros((B, C_out, L), np.float32)
    for i in range(T):
        for k in range(K):
            t = i * stride - pad + k
            if 0 <= t < L:
                out[:, :, t] += np.einsum('bc,co->bo', x[:, :, i], W[:, :, k])
    return out + b[None, :, None]


def _reference_forward(x, params):
    x = np.asarray(x, np.float32)
    n_layers = len(params)
    for i, (W, b, K, s, p) in enumerate(params):
        x = _conv_transpose1d_ref(x, np.asarray(W, np.float32),
                                  np.asarray(b, np.float32), s, p)
        if i + 1 != n_layers:
            x = np.where(x >= 0, x, 0.4 * x)       # LeakyReLU(0.4)
    return x


# ----------------------------------------------------------------------------
if __name__ == "__main__":
    B, T = 2, 16
    in_channels, out_channels, hidden_channels = 4, 4, 32
    scales = [4, 4]
    kernel_size = [8, 8]

    key = jax.random.PRNGKey(0)
    params = []
    dims_in = [in_channels, hidden_channels]
    dims_out = [hidden_channels, out_channels]
    for i in range(len(scales)):
        K, s = kernel_size[i], scales[i]
        p = (K - s) // 2                                 # module's padding rule
        key, kw, kb = jax.random.split(key, 3)
        bound = 1.0 / np.sqrt(dims_in[i] * K)            # PyTorch-style uniform init
        W = jax.random.uniform(kw, (dims_in[i], dims_out[i], K),
                               jnp.float32, -bound, bound)
        b = jax.random.uniform(kb, (dims_out[i],), jnp.float32, -bound, bound)
        # Round weights to bf16 so the f32 reference sees exactly the values
        # the bf16 kernel sees (comparison then only measures kernel error).
        W = np.asarray(W.astype(jnp.bfloat16).astype(jnp.float32))
        params.append((W, np.asarray(b), K, s, p))

    key, kx = jax.random.split(key)
    x = jax.random.normal(kx, (B, in_channels, T), jnp.float32)
    x = np.asarray(x.astype(jnp.bfloat16).astype(jnp.float32))

    out = transposed_upsample_net_forward(jnp.asarray(x), params, t_tile=8)
    out = jax.block_until_ready(out)

    expected_shape = (B, out_channels, int(np.prod(scales)) * T)
    assert out.shape == expected_shape, (out.shape, expected_shape)

    ref = _reference_forward(x, params)
    np.testing.assert_allclose(np.asarray(out.astype(jnp.float32)), ref,
                               rtol=2e-2, atol=2e-2)

    print("KERNEL_OK")
</pallas_src>

<mosaic_0001>
module attributes {stable_mosaic.version = 11 : i64} {
  func.func @_fused_upsample_kernel(%arg0: i32, %arg1: i32, %arg2: memref<1x1x10x12xbf16, #tpu.memory_space<vmem>>, %arg3: memref<12x128xbf16, #tpu.memory_space<vmem>>, %arg4: memref<1x128xf32, #tpu.memory_space<vmem>>, %arg5: memref<3x128x64xbf16, #tpu.memory_space<vmem>>, %arg6: memref<1x64xf32, #tpu.memory_space<vmem>>, %arg7: memref<1x8x64xbf16, #tpu.memory_space<vmem>>) attributes {dimension_semantics = [#tpu.dimension_semantics<parallel>, #tpu.dimension_semantics<parallel>], iteration_bounds = array<i64: 2, 2>, scalar_prefetch = 0 : i64, scratch_operands = 0 : i64, tpu.core_type = #tpu.core_type<tc>, window_params = [{transform_indices = @transform_0, window_bounds = array<i64: 1, 1, 10, 12>}, {pipeline_mode = #tpu.pipeline_mode<synchronous>, transform_indices = @transform_1, window_bounds = array<i64: 12, 128>}, {pipeline_mode = #tpu.pipeline_mode<synchronous>, transform_indices = @transform_2, window_bounds = array<i64: 1, 128>}, {pipeline_mode = #tpu.pipeline_mode<synchronous>, transform_indices = @transform_3, window_bounds = array<i64: 3, 128, 64>}, {pipeline_mode = #tpu.pipeline_mode<synchronous>, transform_indices = @transform_4, window_bounds = array<i64: 1, 64>}, {transform_indices = @transform_5, window_bounds = array<i64: 1, 8, 64>}]} {
    %c0 = arith.constant 0 : index
    %c0_0 = arith.constant 0 : index
    %c0_1 = arith.constant 0 : index
    %c0_2 = arith.constant 0 : index
    %0 = vector.load %arg2[%c0, %c0_0, %c0_1, %c0_2] : memref<1x1x10x12xbf16, #tpu.memory_space<vmem>>, vector<1x1x10x12xbf16>
    %1 = vector.shape_cast %0 : vector<1x1x10x12xbf16> to vector<10x12xbf16>
    %c0_3 = arith.constant 0 : index
    %c0_4 = arith.constant 0 : index
    %2 = vector.load %arg3[%c0_3, %c0_4] : memref<12x128xbf16, #tpu.memory_space<vmem>>, vector<12x128xbf16>
    %cst = arith.constant dense<0.000000e+00> : vector<10x128xf32>
    %3 = tpu.matmul %1, %2, %cst {dimension_numbers = #tpu.dot_dimension_numbers<[1], [0], [0], [1], [0, 0, 1, 1], [], []>} : vector<10x12xbf16>, vector<12x128xbf16>, vector<10x128xf32> -> vector<10x128xf32>
    %c0_5 = arith.constant 0 : index
    %c0_6 = arith.constant 0 : index
    %4 = vector.load %arg4[%c0_5, %c0_6] : memref<1x128xf32, #tpu.memory_space<vmem>>, vector<1x128xf32>
    %5 = vector.broadcast %4 : vector<1x128xf32> to vector<10x128xf32>
    %6 = arith.addf %3, %5 : vector<10x128xf32>
    %cst_7 = arith.constant 0.000000e+00 : f32
    %7 = vector.broadcast %cst_7 : f32 to vector<10x128xf32>
    %8 = arith.cmpf oge, %6, %7 : vector<10x128xf32>
    %cst_8 = arith.constant 4.000000e-01 : f32
    %9 = vector.broadcast %cst_8 : f32 to vector<10x128xf32>
    %10 = arith.mulf %9, %6 : vector<10x128xf32>
    %11 = arith.select %8, %6, %10 : vector<10x128xi1>, vector<10x128xf32>
    %12 = tpu.iota {dimensions = array<i32: 0>} : vector<10x128xi32>
    %c8_i32 = arith.constant 8 : i32
    %13 = arith.muli %arg1, %c8_i32 : i32
    %c1_i32 = arith.constant 1 : i32
    %14 = arith.subi %13, %c1_i32 : i32
    %15 = vector.broadcast %14 : i32 to vector<10x128xi32>
    %16 = arith.addi %12, %15 : vector<10x128xi32>
    %c0_i32 = arith.constant 0 : i32
    %17 = vector.broadcast %c0_i32 : i32 to vector<10x128xi32>
    %18 = arith.cmpi sge, %16, %17 : vector<10x128xi32>
    %c16_i32 = arith.constant 16 : i32
    %19 = vector.broadcast %c16_i32 : i32 to vector<10x128xi32>
    %20 = arith.cmpi slt, %16, %19 : vector<10x128xi32>
    %21 = arith.andi %18, %20 : vector<10x128xi1>
    %cst_9 = arith.constant 0.000000e+00 : f32
    %22 = vector.broadcast %cst_9 : f32 to vector<10x128xf32>
    %23 = arith.select %21, %11, %22 : vector<10x128xi1>, vector<10x128xf32>
    %24 = arith.truncf %23 : vector<10x128xf32> to vector<10x128xbf16>
    %25 = vector.extract_strided_slice %24 {offsets = [0, 0], sizes = [8, 128], strides = [1, 1]} : vector<10x128xbf16> to vector<8x128xbf16>
    %c0_10 = arith.constant 0 : index
    %c0_11 = arith.constant 0 : index
    %c0_12 = arith.constant 0 : index
    %26 = vector.load %arg5[%c0_10, %c0_11, %c0_12] : memref<3x128x64xbf16, #tpu.memory_space<vmem>>, vector<1x128x64xbf16>
    %27 = vector.shape_cast %26 : vector<1x128x64xbf16> to vector<128x64xbf16>
    %cst_13 = arith.constant dense<0.000000e+00> : vector<8x64xf32>
    %28 = tpu.matmul %25, %27, %cst_13 {dimension_numbers = #tpu.dot_dimension_numbers<[1], [0], [0], [1], [0, 0, 1, 1], [], []>} : vector<8x128xbf16>, vector<128x64xbf16>, vector<8x64xf32> -> vector<8x64xf32>
    %29 = vector.extract_strided_slice %24 {offsets = [1, 0], sizes = [8, 128], strides = [1, 1]} : vector<10x128xbf16> to vector<8x128xbf16>
    %c1 = arith.constant 1 : index
    %c0_14 = arith.constant 0 : index
    %c0_15 = arith.constant 0 : index
    %30 = vector.load %arg5[%c1, %c0_14, %c0_15] : memref<3x128x64xbf16, #tpu.memory_space<vmem>>, vector<1x128x64xbf16>
    %31 = vector.shape_cast %30 : vector<1x128x64xbf16> to vector<128x64xbf16>
    %cst_16 = arith.constant dense<0.000000e+00> : vector<8x64xf32>
    %32 = tpu.matmul %29, %31, %cst_16 {dimension_numbers = #tpu.dot_dimension_numbers<[1], [0], [0], [1], [0, 0, 1, 1], [], []>} : vector<8x128xbf16>, vector<128x64xbf16>, vector<8x64xf32> -> vector<8x64xf32>
    %33 = arith.addf %28, %32 : vector<8x64xf32>
    %34 = vector.extract_strided_slice %24 {offsets = [2, 0], sizes = [8, 128], strides = [1, 1]} : vector<10x128xbf16> to vector<8x128xbf16>
    %c2 = arith.constant 2 : index
    %c0_17 = arith.constant 0 : index
    %c0_18 = arith.constant 0 : index
    %35 = vector.load %arg5[%c2, %c0_17, %c0_18] : memref<3x128x64xbf16, #tpu.memory_space<vmem>>, vector<1x128x64xbf16>
    %36 = vector.shape_cast %35 : vector<1x128x64xbf16> to vector<128x64xbf16>
    %cst_19 = arith.constant dense<0.000000e+00> : vector<8x64xf32>
    %37 = tpu.matmul %34, %36, %cst_19 {dimension_numbers = #tpu.dot_dimension_numbers<[1], [0], [0], [1], [0, 0, 1, 1], [], []>} : vector<8x128xbf16>, vector<128x64xbf16>, vector<8x64xf32> -> vector<8x64xf32>
    %38 = arith.addf %33, %37 : vector<8x64xf32>
    %c0_20 = arith.constant 0 : index
    %c0_21 = arith.constant 0 : index
    %39 = vector.load %arg6[%c0_20, %c0_21] : memref<1x64xf32, #tpu.memory_space<vmem>>, vector<1x64xf32>
    %40 = vector.broadcast %39 : vector<1x64xf32> to vector<8x64xf32>
    %41 = arith.addf %38, %40 : vector<8x64xf32>
    %42 = arith.truncf %41 : vector<8x64xf32> to vector<8x64xbf16>
    %c0_22 = arith.constant 0 : index
    %c0_23 = arith.constant 0 : index
    %c0_24 = arith.constant 0 : index
    %43 = vector.load %arg7[%c0_22, %c0_23, %c0_24] : memref<1x8x64xbf16, #tpu.memory_space<vmem>>, vector<1x8x64xbf16>
    %44 = vector.shape_cast %43 : vector<1x8x64xbf16> to vector<8x64xbf16>
    %45 = vector.shape_cast %42 : vector<8x64xbf16> to vector<1x8x64xbf16>
    tpu.vector_store %arg7[%c0_22, %c0_23, %c0_24], %45 {strides = array<i32>} : memref<1x8x64xbf16, #tpu.memory_space<vmem>>, vector<1x8x64xbf16>,
    return
  }
  func.func @transform_0(%arg0: i32, %arg1: i32) -> (i32, i32, i32, i32) {
    %c0_i32 = arith.constant 0 : i32
    %c0_i32_0 = arith.constant 0 : i32
    %c0_i32_1 = arith.constant 0 : i32
    return %arg0, %arg1, %c0_i32, %c0_i32_0 : i32, i32, i32, i32
  }
  func.func @transform_1(%arg0: i32, %arg1: i32) -> (i32, i32) {
    %c0_i32 = arith.constant 0 : i32
    %c0_i32_0 = arith.constant 0 : i32
    %c0_i32_1 = arith.constant 0 : i32
    return %c0_i32, %c0_i32_0 : i32, i32
  }
  func.func @transform_2(%arg0: i32, %arg1: i32) -> (i32, i32) {
    %c0_i32 = arith.constant 0 : i32
    %c0_i32_0 = arith.constant 0 : i32
    %c0_i32_1 = arith.constant 0 : i32
    return %c0_i32, %c0_i32_0 : i32, i32
  }
  func.func @transform_3(%arg0: i32, %arg1: i32) -> (i32, i32, i32) {
    %c0_i32 = arith.constant 0 : i32
    %c0_i32_0 = arith.constant 0 : i32
    %c0_i32_1 = arith.constant 0 : i32
    %c0_i32_2 = arith.constant 0 : i32
    return %c0_i32, %c0_i32_0, %c0_i32_1 : i32, i32, i32
  }
  func.func @transform_4(%arg0: i32, %arg1: i32) -> (i32, i32) {
    %c0_i32 = arith.constant 0 : i32
    %c0_i32_0 = arith.constant 0 : i32
    %c0_i32_1 = arith.constant 0 : i32
    return %c0_i32, %c0_i32_0 : i32, i32
  }
  func.func @transform_5(%arg0: i32, %arg1: i32) -> (i32, i32, i32) {
    %c0_i32 = arith.constant 0 : i32
    %c0_i32_0 = arith.constant 0 : i32
    return %arg0, %arg1, %c0_i32 : i32, i32, i32
  }
}

</mosaic_0001>

<bundles_post_ra>
// kernel: tpu_custom_call.1
= control target key start
LH: loop header
LB: loop body
LE: loop exit
PB: predicated region body
PF: predicated region fallthrough
CT: control target
= control target key end

     0   :  { %s1425_s0 = inlined_call_operand.vmem [shape: bf16[2,2,10,12], index: 0, kind: input, shape index: {}]   ;;  %s1426_s1 = inlined_call_operand.vmem [shape: bf16[12,128], index: 1, kind: input, shape index: {}]   ;;  %s1427_s2 = inlined_call_operand.vmem [shape: f32[1,128], index: 2, kind: input, shape index: {}]   ;;  %s1428_s3 = inlined_call_operand.vmem [shape: bf16[3,128,64], index: 3, kind: input, shape index: {}]   ;;  %s1429_s4 = inlined_call_operand.vmem [shape: f32[1,64], index: 4, kind: input, shape index: {}]   ;;  %s1430_s5 = inlined_call_operand.hbm [shape: bf16[2,16,64], index: 5, kind: output, shape index: {}]  }
   0x1   :  { %1432 = sst [smem:[#allocation6_spill]] %s1426_s1 }
   0x2   :  { %10 = vsyncpa [#allocation3], 0 }
   0x3   :  { %12 = vsyncpa [#allocation3 + $0x1], 0  ;;  %s1180_s18 = smov 0   ;;  %s1182_s19 = smov 0  }
   0x4   :  { %s1184_s20 = smov 0   ;;  %s1186_s21 = smov 0  }
   0x5   :  { %s1188_s22 = smov 0   ;;  %s1190_s23 = smov 0  }
   0x6   :  { %s1192_s24 = smov 0   ;;  %s1194_s25 = smov 0  }
   0x7 LB: > { %s779_s26 = sadd.s32 4294967295, %s1145_s25   ;;  %s780_s27 = sadd.s32 4294967294, %s1145_s25   ;;  %s1145_s25 = sphi %s1194_s25, %s18_s25   ;;  %s1141_s24 = sphi %s1192_s24, %s1444_s24   ;;  %s1137_s23 = sphi %s1190_s23, %s1443_s23   ;;  %s1133_s22 = sphi %s1188_s22, %s1442_s22   ;;  %s1129_s21 = sphi %s1186_s21, %s1441_s21   ;;  %s1125_s20 = sphi %s1184_s20, %s1440_s20   ;;  %s1121_s19 = sphi %s1182_s19, %s1439_s19   ;;  %s1117_s18 = sphi %s1180_s18, %s1438_s18  }
   0x8   : > { %s27_s28 = sadd.s32 1, %s1137_s23  ;;  %s30_s29 = sadd.s32 1, %s1141_s24 }
   0x9   : > { %p28_p0 = scmp.ge.s32.totalorder %s27_s28, 2  ;;  %p161_p1 = scmp.ne.s32.totalorder %s1125_s20, %s1121_s19 }
   0xa   : > { %p162_p2 = scmp.eq.s32.totalorder %s779_s26, 3  ;;  %p167_p5 = scmp.ne.s32.totalorder %s1121_s19, %s1117_s18 }
   0xb   : > { %s1446_s28 = smov (%p28_p0, %s27_s28), 0  ;;  %s1448_s29 = smov (!%p28_p0, %s30_s29), %s1141_s24 }
   0xc   : > { %s147_s30 = ssub.s32 %s1137_s23, %s1446_s28  ;;  %p1231_p3 = por %p162_p2, %p161_p1 }
   0xd   : > { %p32_p4 = scmp.ge.s32.totalorder %s1448_s29, 2  ;;  %p168_p6 = scmp.eq.s32.totalorder %s780_s27, 3 }
   0xe   : > { %p783_p7 = scmp.ge.s32.totalorder %s1145_s25, 1  ;;  %p210_p9 = scmp.lt.s32.totalorder %s1145_s25, 5 }
   0xf   : > { %s1450_s29 = smov (%p32_p4, %s1448_s29), 0  ;;  %p1240_p8 = por %p168_p6, %p167_p5 }
  0x10   : > { %1434 = sst [smem:[#allocation5_spill]] %s1450_s29  ;;  %s146_s8 = ssub.s32 %s1141_s24, %s1450_s29 }
  0x11   : > { %s151_s9 = sadd.s32 1, %s1125_s20  ;;  %s148_s10 = sor.u32 %s147_s30, %s146_s8 }
  0x12   : > { %p211_p10 = pnand %p783_p7, %p210_p9  ;;  %p149_p11 = scmp.eq.s32.totalorder %s148_s10, 0 }
  0x13   : > { %s1436_s1 = sld [smem:[#allocation6_spill]] (!%p211_p10)  ;;  %p242_p12 = scmp.lt.s32.totalorder (!%p211_p10), %s1133_s22, 1 }
  0x14   : > { %s1249_s11 = scalar_select %p149_p11, %s1125_s20, %s151_s9  }
  0x15   : > { %214 = sbr.rel (%p211_p10) target bundleno = 489 (0x1e9), region = 40  ;;  %p244_p13 = scmp.lt.s32.totalorder (!%p211_p10), %s1129_s21, 1 }
  0x16   : > { %s792_s13 = sshll.u32 (!%p211_p10), %s1129_s21, 3  ;;  %s1149_s17 = smov (!%p211_p10), [#allocation2]  }
  0x17   : > { %s1057_s26 = sshll.u32 (!%p211_p10), %s1149_s17, 4  ;;  %s1058_s26 = int_to_ptr.vmem [resolvable:$false] %s1057_s26 }
  0x1a   : > { %vm277_vm0 = vcmask 1045504   ;;  %v1147_v0 = vmov 0.0   ;;  %v1027_v1 = vld [vmem:[%s1436_s1] sm:$0x3f]   ;;  %vm1148_vm1 = vmmov 0   ;;  %s243_s14 = scalar_select %p242_p12, %s1133_s22, 1  ;;  %v328_v20 = vlaneseq }
  0x1b   : > { %888 = vmatprep.subr.bf16.mxu0 %v1147_v0  ;;  %894 = vmatprep.subr.bf16.mxu1 %v1147_v0  ;;  %v279_v2 = vsel %vm277_vm0, %v1027_v1, 0  ;;  %s245_s15 = scalar_select %p244_p13, %s1129_s21, 1  ;;  %v1031_v3 = vld [vmem:[%s1428_s3 + $0x78] sm:$0xff]   ;;  %v1033_v4 = vld [vmem:[%s1428_s3 + $0x70] sm:$0xff]   ;;  %vm273_vm2 = vcmask 97280   ;;  %v1035_v7 = vld [vmem:[%s1428_s3 + $0x68] sm:$0xff]  }
  0x1c   : > { %890 = vmatprep.mubr.msk.bf16.mxu0 %vm1148_vm1, %v1147_v0  ;;  %910 = vmatprep.mubr.msk.bf16.mxu1 %vm1148_vm1, %v1147_v0  ;;  %s786_s16 = sshll.u32 %s243_s14, 2  ;;  %v1029_v5 = vld [vmem:[%s1428_s3 + $0x38] sm:$0xff]   ;;  %v1030_v8 = vld [vmem:[%s1428_s3 + $0x30] sm:$0xff]   ;;  %v1037_v9 = vld [vmem:[%s1428_s3 + $0x60] sm:$0xff]   ;;  %v329_v21 = vshrl.u32 %v328_v20, 7  ;;  %s855_s1 = sshll.u32 %s1133_s22, 1 }
  0x1d   : > { %889 = vmatpush3.bf16.msra.mxu0 %v279_v2  ;;  %s785_s27 = sshll.u32 %s245_s15, 1  ;;  %895 = vmatpush3.bf16.msra.mxu1 %v1031_v3  ;;  %v1032_v10 = vld [vmem:[%s1428_s3 + $0x28] sm:$0xff]   ;;  %v1034_v11 = vld [vmem:[%s1428_s3 + $0x20] sm:$0xff]   ;;  %v1036_v12 = vld [vmem:[%s1428_s3 + $0x18] sm:$0xff]   ;;  %s694_s29 = sadd.s32 %s1129_s21, %s855_s1  ;;  %vm680_vm12 = vcmask 519168  }
  0x1e   : > { %914 = vmatprep.subr.bf16.mxu0 %v1147_v0  ;;  %s248_s30 = sadd.s32 %s786_s16, %s785_s27  ;;  %896 = vmatprep.subr.bf16.mxu1 %v1147_v0  ;;  %v1038_v13 = vld [vmem:[%s1428_s3 + $0x10] sm:$0xff]   ;;  %v1039_v14 = vld [vmem:[%s1428_s3 + $0x58] sm:$0xff]   ;;  %v1040_v15 = vld [vmem:[%s1428_s3 + $0x8] sm:$0xff]   ;;  %v330_v22 = vadd.s32 8, %v329_v21  ;;  %s239_s27 = sand.u32 1, %s1121_s19  }
  0x1f   : > { %s787_s10 = sshll.u32 %s248_s30, 2  ;;  %v1041_v16 = vld [vmem:[%s1428_s3 + $0x50] sm:$0xff]   ;;  %v1042_v17 = vld [vmem:[%s1428_s3] sm:$0xff]   ;;  %v1043_v18 = vld [vmem:[%s1428_s3 + $0x48] sm:$0xff]   ;;  %s784_s30 = sshll.u32 %s239_s27, 2 }
  0x20   : > { %s250_s14 = scalar_lea.vmem %s1425_s0, %s787_s10  ;;  %v1044_v19 = vld [vmem:[%s1428_s3 + $0x40] sm:$0xff]   ;;  %v1045_v44 = vld [vmem:[%s1428_s3 + $0xb8] sm:$0xff]   ;;  %v1046_v46 = vld [vmem:[%s1428_s3 + $0xb0] sm:$0xff]   ;;  %s856_s10 = sshll.u32 %s694_s29, 6 }
  0x21   : > { %v1028_v6 = vld [vmem:[%s250_s14] sm:$0x1f]   ;;  %897 = vmatpush3.bf16.msra.mxu1 %v1033_v4  ;;  %s793_s14 = sadd.s32 4294967295, %s792_s13  ;;  %v1047_v47 = vld [vmem:[%s1428_s3 + $0xa8] sm:$0xff]   ;;  %v1049_v49 = vld [vmem:[%s1428_s3 + $0x98] sm:$0xff]   ;;  %s241_s12 = scalar_lea.vmem [#allocation2], %s784_s30 }
  0x22   : > { %891 = vmatmul.mubr.msk.bf16.vlgmr.msra.gmra.mxu0 %vm273_vm2, %v1028_v6  ;;  %898 = vmatprep.subr.bf16.mxu1 %v1147_v0  ;;  %v333_v23 = vstv %s793_s14  ;;  %v788_v24 = vld [vmem:[%s1427_s2] ss:$0 sm:$0xff]  ;;  %v1050_v50 = vld [vmem:[%s1428_s3 + $0x90] sm:$0xff]   ;;  %v1051_v51 = vld [vmem:[%s1428_s3 + $0x88] sm:$0xff]   ;;  %s698_s13 = sshll.u32 %s241_s12, 4  ;;  %s1379_s22 = scalar_lea.hbm %s1430_s5, %s856_s10  ;;  %s699_s13 = int_to_ptr.vmem [resolvable:$true] %s698_s13 }
  0x23   : > { %915 = vmatpush3.bf16.msra.mxu0 %v1029_v5  ;;  %930 = vmatprep.mubr.msk.bf16.mxu0 %vm1148_vm1, %v1147_v0  ;;  %v335_v25 = vadd.s32 %v333_v23, %v330_v22  ;;  %v334_v27 = vadd.s32 %v333_v23, %v329_v21  ;;  %v1048_v48 = vld [vmem:[%s1428_s3 + $0xa0] sm:$0xff]   ;;  %s683_s21 = scalar_lea.sflag [#allocation3], %s239_s27  ;;  %s1053_s16 = scalar_lea.vmem %s699_s13, 64 }
  0x24   : > { %916 = vmatprep.subr.bf16.mxu0 %v1147_v0  ;;  %v1052_v52 = vld [vmem:[%s1428_s3 + $0x80] sm:$0xff]   ;;  %p1054_p0 = scmp.ne.s32.totalorder %s699_s13, %s1053_s16  ;;  %s1059_s30 = scalar_lea.vmem %s1058_s26, 128 }
  0x25   : > { %899 = vmatpush3.bf16.msra.mxu1 %v1035_v7  ;;  %vm337_vm3 = vcmp.ge.s32.totalorder %v335_v25, 0  ;;  %vm339_vm4 = vcmp.lt.s32.totalorder %v335_v25, 16  ;;  %vm336_vm6 = vcmp.ge.s32.totalorder %v334_v27, 0  ;;  %vm338_vm7 = vcmp.lt.s32.totalorder %v334_v27, 16  ;;  %p1060_p4 = scmp.lt.s32.totalorder %s699_s13, %s1058_s26  ;;  %p1061_p5 = scmp.lt.s32.totalorder %s1059_s30, %s1053_s16 }
  0x26   : > { %900 = vmatprep.subr.bf16.mxu1 %v1147_v0  ;;  %vm341_vm8 = vmand %vm337_vm3, %vm339_vm4  ;;  %p1055_p1 = pnand %p1054_p0, %p1231_p3 }
  0x27   : > { %917 = vmatpush3.bf16.msra.mxu0 %v1030_v8  ;;  %vm340_vm9 = vmand %vm336_vm6, %vm338_vm7  ;;  %p1062_p6 = por %p1061_p5, %p1060_p4 }
  0x28   : > { %918 = vmatprep.subr.bf16.mxu0 %v1147_v0  ;;  %vm826_vm11 = vmpackc.low %vm341_vm8, %vm340_vm9  ;;  %p1056_p2 = pneg %p1055_p1 }
  0x29   : > { %901 = vmatpush3.bf16.msra.mxu1 %v1037_v9 }
  0x2a   : > { %902 = vmatprep.subr.bf16.mxu1 %v1147_v0  ;;  %p1063_p7 = pnand %p1062_p6, %p1056_p2 }
  0x2b   : > { %919 = vmatpush3.bf16.msra.mxu0 %v1032_v10 }
  0x2c   : > { %920 = vmatprep.subr.bf16.mxu0 %v1147_v0 }
  0x2d   : > { %903 = vmatpush3.bf16.msra.mxu1 %v1039_v14 }
  0x2e   : > { %904 = vmatprep.subr.bf16.mxu1 %v1147_v0 }
  0x2f   : > { %921 = vmatpush3.bf16.msra.mxu0 %v1034_v11 }
  0x30   : > { %922 = vmatprep.subr.bf16.mxu0 %v1147_v0 }
  0x31   : > { %905 = vmatpush3.bf16.msra.mxu1 %v1041_v16 }
  0x32   : > { %906 = vmatprep.subr.bf16.mxu1 %v1147_v0 }
  0x33   : > { %923 = vmatpush3.bf16.msra.mxu0 %v1036_v12 }
  0x34   : > { %924 = vmatprep.subr.bf16.mxu0 %v1147_v0 }
  0x35   : > { %907 = vmatpush3.bf16.msra.mxu1 %v1043_v18 }
  0x36   : > { %908 = vmatprep.subr.bf16.mxu1 %v1147_v0 }
  0x37   : > { %925 = vmatpush3.bf16.msra.mxu0 %v1038_v13 }
  0x38   : > { %926 = vmatprep.subr.bf16.mxu0 %v1147_v0 }
  0x39   : > { %909 = vmatpush3.bf16.msra.mxu1 %v1044_v19 }
  0x3a   : > { %934 = vmatprep.subr.bf16.mxu1 %v1147_v0 }
  0x3b   : > { %927 = vmatpush3.bf16.msra.mxu0 %v1040_v15 }
  0x3c   : > { %928 = vmatprep.subr.bf16.mxu0 %v1147_v0 }
  0x3f   : > { %929 = vmatpush3.bf16.msra.mxu0 %v1042_v17 }
  0xe2   : > { %v315_v26 = vpop.f32.mrf.mxu0 }
  0xe3   : > { %v316_v28 = vadd.f32 %v788_v24, %v315_v26 }
  0xe4   : > { %v892_v29 = vpop.f32.mrf.mxu0 }
  0xe5   : > { %v324_v30 = vmul.f32 0.4, %v316_v28  ;;  %vm322_vm5 = vcmp.ge.f32.partialorder %v316_v28, 0.0 }
  0xe6   : > { %v318_v31 = vpop.f32.mrf.mxu0 }
  0xe7   : > { %v319_v32 = vadd.f32 %v788_v24, %v318_v31  ;;  %v326_v34 = vsel %vm322_vm5, %v316_v28, %v324_v30 }
  0xe8   : > { %v893_v33 = vpop.f32.mrf.mxu0  ;;  %v342_v37 = vsel %vm340_vm9, %v326_v34, 0.0 }
  0xe9   : > { %vm323_vm10 = vcmp.ge.f32.partialorder %v319_v32, 0.0  ;;  %v325_v35 = vmul.f32 0.4, %v319_v32 }
  0xeb   : > { %v327_v36 = vsel %vm323_vm10, %v319_v32, %v325_v35 }
  0xec   : > { %v343_v38 = vsel %vm341_vm8, %v327_v36, 0.0  ;;  %v827_v39 = vpack.c.bf16 %v327_v36, %v326_v34 }
  0xed   : > { %v344_v40 = vpack.c.bf16 %v343_v38, %v342_v37 }
  0xee   : > { %931 = vmatmul.mubr.msk.bf16.vlgmr.msra.gmra.mxu0 %vm826_vm11, %v827_v39 }
  0xef   : > { %v381_v41 = vshll.u32 %v344_v40, 16  ;;  %v379_v42 = vshrl.u32 %v344_v40, 16  ;;  %v580_v53 = vrot.slane %v344_v40, 1 }
  0xf1   : > { %v383_v43 = vrot.slane %v381_v41, 1 }
  0xf3   : > { %v384_v45 = vor.u32 %v383_v43, %v379_v42 }
  0xf5   : > { %911 = vmatmul.mubr.bf16.vlgmr.msra.gmra.mxu1 %v384_v45 }
  0xf6   : > { %935 = vmatpush3.bf16.msra.mxu1 %v1045_v44  ;;  %950 = vmatprep.mubr.msk.bf16.mxu1 %vm1148_vm1, %v1147_v0 }
  0xf7   : > { %936 = vmatprep.subr.bf16.mxu1 %v1147_v0 }
  0xfa   : > { %937 = vmatpush3.bf16.msra.mxu1 %v1046_v46 }
  0xfb   : > { %938 = vmatprep.subr.bf16.mxu1 %v1147_v0 }
  0xfe   : > { %939 = vmatpush3.bf16.msra.mxu1 %v1047_v47 }
  0xff   : > { %940 = vmatprep.subr.bf16.mxu1 %v1147_v0 }
 0x102   : > { %941 = vmatpush3.bf16.msra.mxu1 %v1048_v48 }
 0x103   : > { %942 = vmatprep.subr.bf16.mxu1 %v1147_v0 }
 0x106   : > { %943 = vmatpush3.bf16.msra.mxu1 %v1049_v49 }
 0x107   : > { %944 = vmatprep.subr.bf16.mxu1 %v1147_v0 }
 0x10a   : > { %945 = vmatpush3.bf16.msra.mxu1 %v1050_v50 }
 0x10b   : > { %946 = vmatprep.subr.bf16.mxu1 %v1147_v0 }
 0x10e   : > { %947 = vmatpush3.bf16.msra.mxu1 %v1051_v51 }
 0x10f   : > { %948 = vmatprep.subr.bf16.mxu1 %v1147_v0  ;;  %v853_v0 = vld [vmem:[%s1429_s4] ss:$0 sm:$0xff] }
 0x112   : > { %949 = vmatpush3.bf16.msra.mxu1 %v1052_v52 }
 0x115   : > { %951 = vmatmul.mubr.bf16.vlgmr.msra.gmra.mxu1 %v580_v53 }
 0x1ae   : > { %v556_v54 = vpop.f32.mrf.mxu0 }
 0x1b0   : > { %v932_v55 = vpop.f32.mrf.mxu0 }
 0x1b2   : > { %v559_v56 = vpop.f32.mrf.mxu0 }
 0x1b4   : > { %v933_v57 = vpop.f32.mrf.mxu0 }
 0x1b5   : > { %v468_v58 = vpop.f32.mrf.mxu1 }
 0x1b6   : > { %v557_v62 = vadd.f32 %v556_v54, %v468_v58 }
 0x1b7   : > { %v912_v59 = vpop.f32.mrf.mxu1 }
 0x1b9   : > { %v471_v60 = vpop.f32.mrf.mxu1 }
 0x1bb   : > { %v913_v61 = vpop.f32.mrf.mxu1 }
 0x1d5   : > { %v664_v63 = vpop.f32.mrf.mxu1 }
 0x1d6   : > { %v670_v1 = vadd.f32 %v664_v63, %v557_v62 }
 0x1d7   : > { %v952_v2 = vpop.f32.mrf.mxu1 }
 0x1d8   : > { %v678_v3 = vadd.f32 %v853_v0, %v670_v1 }
 0x1d9   : > { %v667_v4 = vpop.f32.mrf.mxu1 }
 0x1da   : > { %v679_v5 = vpack.c.bf16 %v678_v3, %v678_v3 }
 0x1db   : > { %v953_v6 = vpop.f32.mrf.mxu1 }
 0x1dc   : > { %681 = vst.msk [vmem:[%s241_s12] sm:$0xf] %vm680_vm12, %v679_v5 }
 0x1dd   : > { %1066 = shalt.err (!%p1063_p7)
}
 0x1de   : > { %s1067_s1 = scalar_lea.hbm %s1379_s22, 64  ;;  %s1071_s8 = scalar_lea.hbm %s1430_s5, 256 }
 0x1df   : > { %p1068_p9 = scmp.ne.s32.totalorder %s1379_s22, %s1067_s1  ;;  %p1072_p12 = scmp.lt.s32.totalorder %s1379_s22, %s1430_s5 }
 0x1e0   : > { %p1073_p13 = scmp.lt.s32.totalorder %s1071_s8, %s1067_s1 }
 0x1e1   : > { %p1069_p10 = pnand %p1068_p9, %p1231_p3 }
 0x1e2   : > { %p1074_p0 = por %p1073_p13, %p1072_p12 }
 0x1e3   : > { %p1070_p11 = pneg %p1069_p10 }
 0x1e5   : > { %p1075_p1 = pnand %p1074_p0, %p1070_p11 }
 0x1e7   : > { %1078 = shalt.err (!%p1075_p1)
}
 0x1e8   : > { %954 = dma.vmem_to_hbm [thread:$0]  (%p1231_p3), %s699_s13, 64, %s1379_s22, %s683_s21  }
 0x1e9 PF: > { %p960_p2 = scmp.ge.s32.totalorder %s1145_s25, 2  ;;  %s710_s12 = sand.u32 1, %s1117_s18  }
 0x1ea   : > { %s711_s14 = scalar_lea.sflag [#allocation3], %s710_s12 }
 0x1eb   : > { %p957_p4 = pnand %p960_p2, %p1240_p8 }
 0x1ed   : > { %p958_p5 = pneg %p957_p4 }
 0x1ef   : > { %1112 = dma.done.wait (%p958_p5), %s711_s14, 64  }
 0x1f0   : > { %1114 = vsyncadd (%p958_p5), %s711_s14, 4294967232  ;;  %s18_s25 = sadd.s32 1, %s1145_s25   ;;  %s1437_s6 = sld [smem:[#allocation5_spill]] }
 0x1f1   : > { %p15_p6 = scmp.ge.s32.totalorder %s18_s25, 6   ;;  %s1438_s18 = smov %s1121_s19 }
 0x1f2   : > { %s1439_s19 = smov %s1125_s20  ;;  %s1440_s20 = smov %s1249_s11 }
 0x1f3   : > { %s1441_s21 = smov %s1137_s23  ;;  %s1442_s22 = smov %s1141_s24 }
 0x1f4   : > { %s1443_s23 = smov %s1446_s28  ;;  %17 = sbr.rel (!%p15_p6) target bundleno = 7 (0x7), region = 77 }
 0x1f6   : > { %s1444_s24 = smov %s1437_s6 }
 0x1f9   :  { %716 = vsyncpa [#allocation3], 1 }
 0x1fa   :  { %718 = vsyncpa [#allocation3 + $0x1], 1 }

</bundles_post_ra>
